<compile_context>
chip_gen: v5e
topology: v5e:2x2
jax: 0.10.0
libtpu: 0.0.40
codegen_flags: <defaults>
</compile_context>

<pallas_src>
import jax
import jax.numpy as jnp
from jax import lax
from jax.experimental import pallas as pl
from jax.experimental.pallas import tpu as pltpu


def _round_up(x, m):
    return ((x + m - 1) // m) * m


def _anchor_dist_kernel(x_ref, a_ref, asq_ref, b_ref, o_ref):
    # x_ref:   (tb, Dp)  input tile (resident across the inner anchor sweep)
    # a_ref:   (tn, Dp)  anchor tile
    # asq_ref: (1, tn)   precomputed ||anchor||^2 for this tile
    # b_ref:   (1, tn)   biases for this tile
    # o_ref:   (tb, tn)  output tile (tn multiple of 128 -> lane-dense stores)
    x = x_ref[...]
    # ||x||^2 per row: one VPU/XLU reduce per tile; ~1/tn of the MXU work, so
    # recomputing it per anchor tile is cheaper than adding grid ordering
    # constraints to cache it in scratch.
    x_sq = jnp.sum(x * x, axis=-1, keepdims=True)                      # (tb, 1)
    # Cross term on the MXU: x @ anchors.T with f32 accumulation.
    cross = lax.dot_general(
        x, a_ref[...],
        dimension_numbers=(((1,), (1,)), ((), ())),
        preferred_element_type=jnp.float32)                            # (tb, tn)
    # ||x - a||^2 = ||x||^2 - 2 x.a + ||a||^2 ; clamp rounding-induced negatives.
    sq = jnp.maximum(x_sq - 2.0 * cross + asq_ref[...], 0.0)
    # sqrt via EUP rsqrt (its own bundle slot); safe at sq == 0 (0 * finite = 0).
    dist = sq * lax.rsqrt(jnp.maximum(sq, 1e-30))
    o_ref[...] = dist - b_ref[...]


def anchor_net_forward(x, anchors, biases, *, tb=256, tn=256):
    """x: (B, ...) flattened to (B, INPUT_D); anchors: (O, INPUT_D); biases: (O,).

    Returns (B, O) float32: L2 distance of each row of x to each anchor,
    minus the anchor's bias (matches AnchorNet.forward).
    """
    x = x.reshape(x.shape[0], -1).astype(jnp.float32)
    anchors = anchors.astype(jnp.float32)
    biases = biases.astype(jnp.float32)

    B, D = x.shape
    O = anchors.shape[0]
    assert anchors.shape[1] == D and biases.shape == (O,)

    # Pad feature axis to a lane multiple (zero padding does not change norms).
    Dp = _round_up(D, 128)

    # Pick tiles: anchor tile lane-dense (multiple of 128), batch tile a
    # multiple of 8; clamp both for tiny problems.
    tn = min(tn, _round_up(O, 128))
    tb = min(tb, _round_up(B, 8))

    # Shrink tiles if a full-D block set would blow the default VMEM budget
    # (x tile, anchor tile, out tile, each double-buffered).
    vmem_budget = 24 * 1024 * 1024

    def _tile_bytes(tb_, tn_):
        return 4 * 2 * (tb_ * Dp + tn_ * Dp + tb_ * tn_ + 2 * tn_)

    while tb > 8 and _tile_bytes(tb, tn) > vmem_budget:
        tb = max(8, _round_up(tb // 2, 8))
    while tn > 128 and _tile_bytes(tb, tn) > vmem_budget:
        tn = max(128, _round_up(tn // 2, 128))

    Bp = _round_up(B, tb)
    Op = _round_up(O, tn)

    x_p = jnp.pad(x, ((0, Bp - B), (0, Dp - D)))
    a_p = jnp.pad(anchors, ((0, Op - O), (0, Dp - D)))
    b_p = jnp.pad(biases, (0, Op - O)).reshape(1, Op)
    # ||anchors||^2 precomputed once (wrapper-side), streamed per O-tile.
    asq_p = jnp.sum(a_p * a_p, axis=-1).reshape(1, Op)

    grid = (Bp // tb, Op // tn)  # batch outer -> x tile loaded once per sweep

    out = pl.pallas_call(
        _anchor_dist_kernel,
        out_shape=jax.ShapeDtypeStruct((Bp, Op), jnp.float32),
        grid_spec=pltpu.PrefetchScalarGridSpec(
            num_scalar_prefetch=0,
            grid=grid,
            in_specs=[
                pl.BlockSpec((tb, Dp), lambda i, j: (i, 0)),   # x tile
                pl.BlockSpec((tn, Dp), lambda i, j: (j, 0)),   # anchors tile
                pl.BlockSpec((1, tn), lambda i, j: (0, j)),    # ||anchors||^2
                pl.BlockSpec((1, tn), lambda i, j: (0, j)),    # biases
            ],
            out_specs=pl.BlockSpec((tb, tn), lambda i, j: (i, j)),
        ),
        compiler_params=pltpu.CompilerParams(
            dimension_semantics=("parallel", "parallel")),
        cost_estimate=pl.CostEstimate(
            flops=2 * Bp * Op * Dp,
            transcendentals=Bp * Op,
            bytes_accessed=4 * (Bp * Dp + (Bp // tb) * Op * Dp + Bp * Op + 2 * Op)),
    )(x_p, a_p, asq_p, b_p)

    return out[:B, :O]


def init_anchor_net(train_data, INPUT_D, OUTPUT_D, key):
    """Re-implementation of AnchorNet.__init__ (test=False).

    anchors ~ randn(OUTPUT_D, INPUT_D)
    biases  = anchor_dist(train_data).mean(0)  (computed with the same kernel,
              using a zero bias so the kernel returns raw distances)
    """
    anchors = jax.random.normal(key, (OUTPUT_D, INPUT_D), dtype=jnp.float32)
    zero_bias = jnp.zeros((OUTPUT_D,), dtype=jnp.float32)
    train_flat = train_data.reshape(train_data.shape[0], -1)
    train_dists = anchor_net_forward(train_flat, anchors, zero_bias)   # (N, O)
    biases = jnp.mean(train_dists, axis=0)                             # (O,)
    return anchors, biases


if __name__ == "__main__":
    INPUT_D = 32
    OUTPUT_D = 16
    N_TRAIN = 16
    BATCH = 8

    key = jax.random.PRNGKey(0)
    k_anchor, k_train, k_x = jax.random.split(key, 3)

    train_data = jax.random.normal(k_train, (N_TRAIN, INPUT_D), dtype=jnp.float32)
    anchors, biases = init_anchor_net(train_data, INPUT_D, OUTPUT_D, k_anchor)

    x = jax.random.normal(k_x, (BATCH, INPUT_D), dtype=jnp.float32)
    out = anchor_net_forward(x, anchors, biases)
    out = jax.block_until_ready(out)

    # Pure-JAX reference check (direct-difference formula, outside Pallas).
    ref = jnp.sqrt(jnp.sum((x[:, None, :] - anchors[None, :, :]) ** 2, axis=-1)) - biases
    assert out.shape == (BATCH, OUTPUT_D)
    # Slightly looser tolerance: the ||x||^2 - 2x.a + ||a||^2 expansion cancels.
    assert jnp.allclose(out, ref, atol=2e-3, rtol=2e-3)

    print("KERNEL_OK")
</pallas_src>

<mosaic_0001>
module attributes {stable_mosaic.version = 11 : i64} {
  func.func @_anchor_dist_kernel(%arg0: i32, %arg1: i32, %arg2: memref<16x128xf32, #tpu.memory_space<vmem>>, %arg3: memref<128x128xf32, #tpu.memory_space<vmem>>, %arg4: memref<1x128xf32, #tpu.memory_space<vmem>>, %arg5: memref<1x128xf32, #tpu.memory_space<vmem>>, %arg6: memref<16x128xf32, #tpu.memory_space<vmem>>) attributes {dimension_semantics = [#tpu.dimension_semantics<parallel>, #tpu.dimension_semantics<parallel>], iteration_bounds = array<i64: 1, 1>, scalar_prefetch = 0 : i64, scratch_operands = 0 : i64, tpu.core_type = #tpu.core_type<tc>, window_params = [{transform_indices = @transform_0, window_bounds = array<i64: 16, 128>}, {transform_indices = @transform_1, window_bounds = array<i64: 128, 128>}, {transform_indices = @transform_2, window_bounds = array<i64: 1, 128>}, {transform_indices = @transform_3, window_bounds = array<i64: 1, 128>}, {transform_indices = @transform_4, window_bounds = array<i64: 16, 128>}]} {
    %c0 = arith.constant 0 : index
    %c0_0 = arith.constant 0 : index
    %0 = vector.load %arg2[%c0, %c0_0] : memref<16x128xf32, #tpu.memory_space<vmem>>, vector<16x128xf32>
    %1 = arith.mulf %0, %0 : vector<16x128xf32>
    %cst = arith.constant dense<0.000000e+00> : vector<16xf32>
    %2 = vector.multi_reduction <add>, %1, %cst [1] : vector<16x128xf32> to vector<16xf32>
    %3 = vector.shape_cast %2 : vector<16xf32> to vector<16x1xf32>
    %c0_1 = arith.constant 0 : index
    %c0_2 = arith.constant 0 : index
    %4 = vector.load %arg3[%c0_1, %c0_2] : memref<128x128xf32, #tpu.memory_space<vmem>>, vector<128x128xf32>
    %cst_3 = arith.constant dense<0.000000e+00> : vector<16x128xf32>
    %5 = tpu.matmul %0, %4, %cst_3 {dimension_numbers = #tpu.dot_dimension_numbers<[1], [1], [0], [0], [0, 0, 1, 0], [], []>} : vector<16x128xf32>, vector<128x128xf32>, vector<16x128xf32> -> vector<16x128xf32>
    %cst_4 = arith.constant 2.000000e+00 : f32
    %6 = vector.broadcast %cst_4 : f32 to vector<16x128xf32>
    %7 = arith.mulf %6, %5 : vector<16x128xf32>
    %8 = vector.broadcast %3 : vector<16x1xf32> to vector<16x128xf32>
    %9 = arith.subf %8, %7 : vector<16x128xf32>
    %c0_5 = arith.constant 0 : index
    %c0_6 = arith.constant 0 : index
    %10 = vector.load %arg4[%c0_5, %c0_6] : memref<1x128xf32, #tpu.memory_space<vmem>>, vector<1x128xf32>
    %11 = vector.broadcast %10 : vector<1x128xf32> to vector<16x128xf32>
    %12 = arith.addf %9, %11 : vector<16x128xf32>
    %cst_7 = arith.constant 0.000000e+00 : f32
    %13 = vector.broadcast %cst_7 : f32 to vector<16x128xf32>
    %14 = arith.maximumf %12, %13 : vector<16x128xf32>
    %cst_8 = arith.constant 1.000000e-30 : f32
    %15 = vector.broadcast %cst_8 : f32 to vector<16x128xf32>
    %16 = arith.maximumf %14, %15 : vector<16x128xf32>
    %17 = math.rsqrt %16 : vector<16x128xf32>
    %18 = arith.mulf %14, %17 : vector<16x128xf32>
    %c0_9 = arith.constant 0 : index
    %c0_10 = arith.constant 0 : index
    %19 = vector.load %arg5[%c0_9, %c0_10] : memref<1x128xf32, #tpu.memory_space<vmem>>, vector<1x128xf32>
    %20 = vector.broadcast %19 : vector<1x128xf32> to vector<16x128xf32>
    %21 = arith.subf %18, %20 : vector<16x128xf32>
    %c0_11 = arith.constant 0 : index
    %c0_12 = arith.constant 0 : index
    %22 = vector.load %arg6[%c0_11, %c0_12] : memref<16x128xf32, #tpu.memory_space<vmem>>, vector<16x128xf32>
    tpu.vector_store %arg6[%c0_11, %c0_12], %21 {strides = array<i32>} : memref<16x128xf32, #tpu.memory_space<vmem>>, vector<16x128xf32>,
    return
  }
  func.func @transform_0(%arg0: i32, %arg1: i32) -> (i32, i32) {
    %c0_i32 = arith.constant 0 : i32
    %c0_i32_0 = arith.constant 0 : i32
    return %arg0, %c0_i32 : i32, i32
  }
  func.func @transform_1(%arg0: i32, %arg1: i32) -> (i32, i32) {
    %c0_i32 = arith.constant 0 : i32
    %c0_i32_0 = arith.constant 0 : i32
    return %arg1, %c0_i32 : i32, i32
  }
  func.func @transform_2(%arg0: i32, %arg1: i32) -> (i32, i32) {
    %c0_i32 = arith.constant 0 : i32
    %c0_i32_0 = arith.constant 0 : i32
    return %c0_i32, %arg1 : i32, i32
  }
  func.func @transform_3(%arg0: i32, %arg1: i32) -> (i32, i32) {
    %c0_i32 = arith.constant 0 : i32
    %c0_i32_0 = arith.constant 0 : i32
    return %c0_i32, %arg1 : i32, i32
  }
  func.func @transform_4(%arg0: i32, %arg1: i32) -> (i32, i32) {
    %c0_i32 = arith.constant 0 : i32
    return %arg0, %arg1 : i32, i32
  }
}

</mosaic_0001>

<bundles_post_ra>
// kernel: tpu_custom_call.1
= control target key start
LH: loop header
LB: loop body
LE: loop exit
PB: predicated region body
PF: predicated region fallthrough
CT: control target
= control target key end

     0   :  { %9 = vsyncpa [#allocation3], 0  ;;  %s320_s0 = inlined_call_operand.hbm [shape: f32[16,128], index: 0, kind: input, shape index: {}]   ;;  %s321_s1 = inlined_call_operand.hbm [shape: f32[128,128], index: 1, kind: input, shape index: {}]   ;;  %s322_s2 = inlined_call_operand.vmem [shape: f32[1,128], index: 2, kind: input, shape index: {}]   ;;  %s323_s3 = inlined_call_operand.vmem [shape: f32[1,128], index: 3, kind: input, shape index: {}]   ;;  %s324_s4 = inlined_call_operand.hbm [shape: f32[16,128], index: 4, kind: output, shape index: {}]  }
   0x1   :  { %10 = vsyncpa [#allocation6], 0 }
   0x2   :  { %11 = vsyncpa [#allocation4], 0  ;;  %s16_s17 = sshll.u32 %s320_s0, 4  ;;  %s266_s18 = smov [#allocation2]   ;;  %s17_s17 = int_to_ptr.hbm [resolvable:$true] %s16_s17 }
   0x3   :  { %s18_s19 = sshll.u32 %s266_s18, 4  ;;  %s29_s22 = sshll.u32 %s321_s1, 4  ;;  %s19_s19 = int_to_ptr.vmem [resolvable:$true] %s18_s19  ;;  %s30_s22 = int_to_ptr.hbm [resolvable:$true] %s29_s22 }
   0x4   :  { %s267_s23 = smov 128   ;;  %s268_s24 = smov 8  }
   0x5   :  { %24 = dma.hbm_to_vmem [thread:$0]  %s17_s17, 256, %s19_s19, [#allocation3], %s267_s23, %s267_s23, %s268_s24  }
   0x6   :  { %s269_s25 = smov [#allocation5]  }
   0x7   :  { %s31_s26 = sshll.u32 %s269_s25, 4  ;;  %s32_s26 = int_to_ptr.vmem [resolvable:$true] %s31_s26 }
   0x8   :  { %37 = dma.hbm_to_vmem [thread:$0]  %s30_s22, 2048, %s32_s26, [#allocation6], %s267_s23, %s267_s23, %s268_s24  }
   0x9   :  { %260 = dma.done.wait [#allocation3], 256  }
   0xa   :  { %261 = vsyncadd [#allocation3], 4294967040 }
   0xb   :  { %262 = dma.done.wait [#allocation6], 2048  }
   0xc   :  { %263 = vsyncadd [#allocation6], 4294965248  ;;  %v73_v0 = vld [vmem:[#allocation5 + $0x78] sm:$0xff]  ;;  %v72_v1 = vld [vmem:[#allocation5 + $0x70] sm:$0xff]  ;;  %s270_s28 = smov [#allocation7]   ;;  %s147_s6 = sshll.u32 %s324_s4, 4  ;;  %s148_s6 = int_to_ptr.hbm [resolvable:$true] %s147_s6 }
   0xd   :  { %74 = vmatpush.xpose.msra.mxu0 %v73_v0  ;;  %161 = vmatpush.xpose.msra.mxu1 %v73_v0  ;;  %v71_v2 = vld [vmem:[#allocation5 + $0x68] sm:$0xff]  ;;  %v70_v3 = vld [vmem:[#allocation5 + $0x60] sm:$0xff]  ;;  %v69_v4 = vld [vmem:[#allocation5 + $0x58] sm:$0xff]  ;;  %s145_s29 = sshll.u32 %s270_s28, 4  ;;  %s146_s29 = int_to_ptr.vmem [resolvable:$true] %s145_s29 }
   0xe   :  { %v68_v5 = vld [vmem:[#allocation5 + $0x50] sm:$0xff]  ;;  %v67_v6 = vld [vmem:[#allocation5 + $0x48] sm:$0xff]  ;;  %v66_v7 = vld [vmem:[#allocation5 + $0x40] sm:$0xff] }
   0xf   :  { %v65_v8 = vld [vmem:[#allocation5 + $0x38] sm:$0xff]  ;;  %v50_v9 = vld [vmem:[#allocation2] sm:$0xff]  ;;  %v63_v13 = vld [vmem:[#allocation5 + $0x28] sm:$0xff] }
  0x10   :  { %v52_v10 = vmul.f32 %v50_v9, %v50_v9  ;;  %v64_v11 = vld [vmem:[#allocation5 + $0x30] sm:$0xff]  ;;  %v51_v12 = vld [vmem:[#allocation2 + $0x8] sm:$0xff]  ;;  %v62_v15 = vld [vmem:[#allocation5 + $0x20] sm:$0xff] }
  0x11   :  { %75 = vmatpush.xpose.msra.mxu0 %v72_v1  ;;  %162 = vmatpush.xpose.msra.mxu1 %v72_v1  ;;  %v53_v14 = vmul.f32 %v51_v12, %v51_v12  ;;  %v61_v16 = vld [vmem:[#allocation5 + $0x18] sm:$0xff]  ;;  %v60_v17 = vld [vmem:[#allocation5 + $0x10] sm:$0xff]  ;;  %v59_v18 = vld [vmem:[#allocation5 + $0x8] sm:$0xff] }
  0x12   :  { %54 = vadd.xlane.f32.xlu0 %v52_v10  ;;  %v58_v19 = vld [vmem:[#allocation5] sm:$0xff]  ;;  %v182_v25 = vld [vmem:[%s322_s2] ss:$0 sm:$0xff] }
  0x13   :  { %v183_v46 = vld [vmem:[%s323_s3] ss:$0 sm:$0xff] }
  0x15   :  { %76 = vmatpush.xpose.msra.mxu0 %v71_v2  ;;  %163 = vmatpush.xpose.msra.mxu1 %v71_v2 }
  0x19   :  { %77 = vmatpush.xpose.msra.mxu0 %v70_v3  ;;  %164 = vmatpush.xpose.msra.mxu1 %v70_v3 }
  0x1a   :  { %56 = vadd.xlane.f32.xlu0 %v53_v14 }
  0x1d   :  { %78 = vmatpush.xpose.msra.mxu0 %v69_v4  ;;  %165 = vmatpush.xpose.msra.mxu1 %v69_v4 }
  0x21   :  { %79 = vmatpush.xpose.msra.mxu0 %v68_v5  ;;  %166 = vmatpush.xpose.msra.mxu1 %v68_v5 }
  0x25   :  { %80 = vmatpush.xpose.msra.mxu0 %v67_v6  ;;  %167 = vmatpush.xpose.msra.mxu1 %v67_v6 }
  0x29   :  { %81 = vmatpush.xpose.msra.mxu0 %v66_v7  ;;  %168 = vmatpush.xpose.msra.mxu1 %v66_v7 }
  0x2d   :  { %82 = vmatpush.xpose.msra.mxu0 %v65_v8  ;;  %169 = vmatpush.xpose.msra.mxu1 %v65_v8 }
  0x31   :  { %83 = vmatpush.xpose.msra.mxu0 %v64_v11  ;;  %170 = vmatpush.xpose.msra.mxu1 %v64_v11 }
  0x35   :  { %84 = vmatpush.xpose.msra.mxu0 %v63_v13  ;;  %171 = vmatpush.xpose.msra.mxu1 %v63_v13 }
  0x39   :  { %85 = vmatpush.xpose.msra.mxu0 %v62_v15  ;;  %172 = vmatpush.xpose.msra.mxu1 %v62_v15 }
  0x3d   :  { %86 = vmatpush.xpose.msra.mxu0 %v61_v16  ;;  %173 = vmatpush.xpose.msra.mxu1 %v61_v16 }
  0x41   :  { %87 = vmatpush.xpose.msra.mxu0 %v60_v17  ;;  %174 = vmatpush.xpose.msra.mxu1 %v60_v17 }
  0x45   :  { %88 = vmatpush.xpose.msra.mxu0 %v59_v18  ;;  %175 = vmatpush.xpose.msra.mxu1 %v59_v18 }
  0x49   :  { %89 = vmatpush.xpose.msra.mxu0 %v58_v19  ;;  %176 = vmatpush.xpose.msra.mxu1 %v58_v19 }
  0x4c   :  { %90 = vmatmul.f32.vlgmr.msra.gmra.mxu0 %v50_v9  ;;  %93 = vmatmul.f32.vlgmr.msra.gmra.mxu1 %v51_v12 }
  0x85   :  { %v55_v20 = vpop.xlane.xlu0 %54 }
  0x8d   :  { %v57_v21 = vpop.xlane.xlu0 %56 }
  0xc9   :  { %v91_v22 = vpop.f32.mrf.mxu0  ;;  %v94_v23 = vpop.f32.mrf.mxu1 }
  0xca   :  { %v97_v24 = vmul.f32 2.0, %v91_v22  ;;  %v98_v26 = vmul.f32 2.0, %v94_v23 }
  0xcc   :  { %v99_v27 = vsub.f32 %v55_v20, %v97_v24  ;;  %v100_v28 = vsub.f32 %v57_v21, %v98_v26 }
  0xce   :  { %v105_v29 = vadd.f32 %v182_v25, %v99_v27  ;;  %v106_v30 = vadd.f32 %v182_v25, %v100_v28 }
  0xd0   :  { %v107_v31 = vmax.f32 %v105_v29, 0.0  ;;  %v108_v32 = vmax.f32 %v106_v30, 0.0 }
  0xd2   :  { %v109_v33 = vmax.f32 %v107_v31, 1e-30  ;;  %v110_v34 = vmax.f32 %v108_v32, 1e-30 }
  0xd4   :  { %184 = vrsqrt.f32 %v109_v33  ;;  %vm117_vm2 = vweird.f32 %v109_v33  ;;  %vm127_vm4 = vweird.f32 %v110_v34 }
  0xd5   :  { %186 = vrsqrt.f32 %v110_v34 }
  0xda   :  { %v185_v35 = vpop.eup %184 }
  0xdb   :  { %v187_v36 = vpop.eup %186  ;;  %v112_v37 = vmul.f32 %v185_v35, %v109_v33  ;;  %vm118_vm0 = vweird.f32 %v185_v35 }
  0xdc   :  { %v122_v38 = vmul.f32 %v187_v36, %v110_v34  ;;  %vm128_vm1 = vweird.f32 %v187_v36  ;;  %vm119_vm3 = vmor %vm117_vm2, %vm118_vm0 }
  0xdd   :  { %v113_v39 = vmul.f32 %v185_v35, %v112_v37  ;;  %vm129_vm5 = vmor %vm127_vm4, %vm128_vm1 }
  0xde   :  { %v123_v40 = vmul.f32 %v187_v36, %v122_v38 }
  0xdf   :  { %v114_v41 = vmul.f32 0.5, %v113_v39 }
  0xe0   :  { %v124_v42 = vmul.f32 0.5, %v123_v40 }
  0xe1   :  { %v115_v43 = vsub.f32 1.5, %v114_v41 }
  0xe2   :  { %v125_v44 = vsub.f32 1.5, %v124_v42 }
  0xe3   :  { %v116_v45 = vmul.f32 %v185_v35, %v115_v43 }
  0xe4   :  { %v126_v47 = vmul.f32 %v187_v36, %v125_v44 }
  0xe5   :  { %v120_v48 = vsel %vm119_vm3, %v185_v35, %v116_v45 }
  0xe6   :  { %v131_v49 = vmul.f32 %v120_v48, %v107_v31  ;;  %v130_v50 = vsel %vm129_vm5, %v187_v36, %v126_v47 }
  0xe7   :  { %v132_v51 = vmul.f32 %v130_v50, %v108_v32 }
  0xe8   :  { %v137_v52 = vsub.f32 %v131_v49, %v183_v46 }
  0xe9   :  { %v138_v53 = vsub.f32 %v132_v51, %v183_v46 }
  0xea   :  { %139 = vst [vmem:[#allocation7] sm:$0xff] %v137_v52 }
  0xeb   :  { %140 = vst [vmem:[#allocation7 + $0x8] sm:$0xff] %v138_v53 }
  0xec   :  { %153 = dma.vmem_to_hbm [thread:$0]  %s146_s29, 256, %s148_s6, [#allocation4], %s267_s23, %s267_s23, %s268_s24  }
  0xed   :  { %264 = dma.done.wait [#allocation4], 256  }
  0xee   :  { %265 = vsyncadd [#allocation4], 4294967040 }
  0xef   :  { %158 = vsyncpa [#allocation3], 1 }
  0xf0   :  { %159 = vsyncpa [#allocation6], 1 }
  0xf1   :  { %160 = vsyncpa [#allocation4], 1 }

</bundles_post_ra>
